<compile_context>
chip_gen: v7x
topology: tpu7x:2x2x1
jax: 0.10.0
libtpu: 0.0.40
codegen_flags: <defaults>
</compile_context>

<pallas_src>
from functools import partial

import jax
import jax.numpy as jnp
from jax.experimental import pallas as pl
from jax.experimental.pallas import tpu as pltpu


def _snake_kernel(x_ref, alpha_ref, inv_ref, o_ref, *, compute_dtype):
    # x_ref block: (1, TC, TT); alpha_ref / inv_ref blocks: (TC, 1).
    x = x_ref[...].astype(compute_dtype)            # (1, TC, TT)
    a = alpha_ref[...].astype(compute_dtype)        # (TC, 1)
    inv = inv_ref[...].astype(compute_dtype)        # (TC, 1), precomputed 1/(a+1e-9)
    s = jnp.sin(a[None, :, :] * x)                  # (1, TC, TT)
    o_ref[...] = (x + inv[None, :, :] * (s * s)).astype(o_ref.dtype)


def _round_up(n: int, m: int) -> int:
    return ((n + m - 1) // m) * m


def snake(x: jax.Array, alpha: jax.Array, *,
          tc_max: int = 256, tt_max: int = 4096,
          vmem_limit_bytes: int = 48 * 1024 * 1024) -> jax.Array:
    """Snake activation. x: (B, C, T), alpha: (C, 1) -> (B, C, T)."""
    B, C, T = x.shape
    assert alpha.shape == (C, 1), f"alpha must be (C, 1), got {alpha.shape}"

    # Exact-epsilon reciprocal, hoisted out of the hot loop (tiny (C,1) array).
    inv = 1.0 / (alpha.astype(jnp.float32) + 1e-9)

    # Lane-dense tiles: TC multiple of 8 (sublanes), TT multiple of 128 (lanes).
    # Partial edge blocks are fine (Pallas masks them); no divisor search.
    TC = min(tc_max, _round_up(C, 8))
    TT = min(tt_max, _round_up(T, 128))
    c_tiles = pl.cdiv(C, TC)
    t_tiles = pl.cdiv(T, TT)

    # v7x megacore: at batch 1 keep >= 2 blocks along a parallel axis so the
    # second TensorCore is not idled by a single giant tile.
    if B == 1 and c_tiles == 1 and t_tiles == 1 and _round_up(T, 128) >= 256:
        TT = _round_up(pl.cdiv(_round_up(T, 128), 2), 128)
        t_tiles = pl.cdiv(T, TT)

    grid = (B, c_tiles, t_tiles)

    # bf16 streams keep the bulk math in bf16 (v6e/v7x VPU/EUP bf16 paths);
    # everything else runs in f32.  The epsilon/reciprocal were already done
    # in f32 above.
    compute_dtype = jnp.bfloat16 if x.dtype == jnp.bfloat16 else jnp.float32
    kernel = partial(_snake_kernel, compute_dtype=compute_dtype)

    return pl.pallas_call(
        kernel,
        out_shape=jax.ShapeDtypeStruct((B, C, T), x.dtype),
        grid_spec=pltpu.PrefetchScalarGridSpec(
            num_scalar_prefetch=0,
            grid=grid,
            in_specs=[
                # x: one (1, TC, TT) lane-dense block per grid step.
                pl.BlockSpec((1, TC, TT), lambda b, c, t: (b, c, t)),
                # alpha / inv: per-channel tiles, constant along b/t so they
                # stay resident across those grid steps.
                pl.BlockSpec((TC, 1), lambda b, c, t: (c, 0)),
                pl.BlockSpec((TC, 1), lambda b, c, t: (c, 0)),
            ],
            out_specs=pl.BlockSpec((1, TC, TT), lambda b, c, t: (b, c, t)),
        ),
        compiler_params=pltpu.CompilerParams(
            # Every grid point writes a distinct output block -> all parallel;
            # lets v7x shard C/T across its two TensorCores even at batch 1.
            dimension_semantics=("parallel", "parallel", "parallel"),
            vmem_limit_bytes=vmem_limit_bytes,
        ),
    )(x, alpha, inv)


def _snake_ref(x, alpha):
    a = alpha[None].astype(jnp.float32)
    xf = x.astype(jnp.float32)
    return (xf + (1.0 / (a + 1e-9)) * jnp.sin(a * xf) ** 2).astype(x.dtype)


if __name__ == "__main__":
    key = jax.random.PRNGKey(0)
    k1, k2, k3, k4 = jax.random.split(key, 4)

    # 1) Small NCT activation consistent with the module (dim == C).
    #    Exercises the ragged-edge path (C % 8 != 0, T % 128 != 0, masked vst).
    B, C, T = 2, 4, 16
    x = jax.random.normal(k1, (B, C, T), dtype=jnp.float32)
    alpha = jnp.ones((C, 1), dtype=jnp.float32)  # nn.Parameter(torch.ones(dim, 1))

    out = jax.block_until_ready(snake(x, alpha))
    assert out.shape == (B, C, T)
    assert jnp.allclose(out, _snake_ref(x, alpha), atol=1e-5, rtol=1e-5), \
        "mismatch vs reference (ragged-edge path)"

    # 2) Multi-T-tile grid path, aligned shapes, non-trivial alpha.
    B2, C2, T2 = 2, 16, 384
    x2 = jax.random.normal(k2, (B2, C2, T2), dtype=jnp.float32)
    alpha2 = 1.0 + 0.1 * jax.random.normal(k3, (C2, 1), dtype=jnp.float32)
    out2 = jax.block_until_ready(snake(x2, alpha2, tt_max=128))
    assert jnp.allclose(out2, _snake_ref(x2, alpha2), atol=1e-5, rtol=1e-5), \
        "mismatch vs reference (multi-tile path)"

    # 3) Multi-T-tile with a ragged last tile (T % TT != 0).
    B3, C3, T3 = 1, 8, 300
    x3 = jax.random.normal(k4, (B3, C3, T3), dtype=jnp.float32)
    alpha3 = jnp.ones((C3, 1), dtype=jnp.float32)
    out3 = jax.block_until_ready(snake(x3, alpha3, tt_max=128))
    assert jnp.allclose(out3, _snake_ref(x3, alpha3), atol=1e-5, rtol=1e-5), \
        "mismatch vs reference (ragged multi-tile path)"

    print("KERNEL_OK")
</pallas_src>

<mosaic_0001>
module attributes {stable_mosaic.version = 11 : i64} {
  func.func @_snake_kernel(%arg0: i32, %arg1: i32, %arg2: i32, %arg3: memref<1x8x128xf32, #tpu.memory_space<vmem>>, %arg4: memref<8x1xf32, #tpu.memory_space<vmem>>, %arg5: memref<8x1xf32, #tpu.memory_space<vmem>>, %arg6: memref<1x8x128xf32, #tpu.memory_space<vmem>>) attributes {dimension_semantics = [#tpu.dimension_semantics<parallel>, #tpu.dimension_semantics<parallel>, #tpu.dimension_semantics<parallel>], iteration_bounds = array<i64: 2, 1, 1>, scalar_prefetch = 0 : i64, scratch_operands = 0 : i64, tpu.core_type = #tpu.core_type<tc>, window_params = [{transform_indices = @transform_0, window_bounds = array<i64: 1, 8, 128>}, {transform_indices = @transform_1, window_bounds = array<i64: 8, 1>}, {transform_indices = @transform_2, window_bounds = array<i64: 8, 1>}, {transform_indices = @transform_3, window_bounds = array<i64: 1, 8, 128>}]} {
    %c0 = arith.constant 0 : index
    %c0_0 = arith.constant 0 : index
    %c0_1 = arith.constant 0 : index
    %0 = vector.load %arg3[%c0, %c0_0, %c0_1] : memref<1x8x128xf32, #tpu.memory_space<vmem>>, vector<1x8x128xf32>
    %c0_2 = arith.constant 0 : index
    %c0_3 = arith.constant 0 : index
    %1 = vector.load %arg4[%c0_2, %c0_3] : memref<8x1xf32, #tpu.memory_space<vmem>>, vector<8x1xf32>
    %c0_4 = arith.constant 0 : index
    %c0_5 = arith.constant 0 : index
    %2 = vector.load %arg5[%c0_4, %c0_5] : memref<8x1xf32, #tpu.memory_space<vmem>>, vector<8x1xf32>
    %3 = vector.shape_cast %1 : vector<8x1xf32> to vector<1x8x1xf32>
    %4 = vector.broadcast %3 : vector<1x8x1xf32> to vector<1x8x128xf32>
    %5 = arith.mulf %4, %0 : vector<1x8x128xf32>
    %6 = math.sin %5 : vector<1x8x128xf32>
    %7 = vector.shape_cast %2 : vector<8x1xf32> to vector<1x8x1xf32>
    %8 = arith.mulf %6, %6 : vector<1x8x128xf32>
    %9 = vector.broadcast %7 : vector<1x8x1xf32> to vector<1x8x128xf32>
    %10 = arith.mulf %9, %8 : vector<1x8x128xf32>
    %11 = arith.addf %0, %10 : vector<1x8x128xf32>
    %c0_6 = arith.constant 0 : index
    %c0_7 = arith.constant 0 : index
    %c0_8 = arith.constant 0 : index
    %12 = vector.load %arg6[%c0_6, %c0_7, %c0_8] : memref<1x8x128xf32, #tpu.memory_space<vmem>>, vector<1x8x128xf32>
    tpu.vector_store %arg6[%c0_6, %c0_7, %c0_8], %11 {strides = array<i32>} : memref<1x8x128xf32, #tpu.memory_space<vmem>>, vector<1x8x128xf32>,
    return
  }
  func.func @transform_0(%arg0: i32, %arg1: i32, %arg2: i32) -> (i32, i32, i32) {
    %c0_i32 = arith.constant 0 : i32
    return %arg0, %arg1, %arg2 : i32, i32, i32
  }
  func.func @transform_1(%arg0: i32, %arg1: i32, %arg2: i32) -> (i32, i32) {
    %c0_i32 = arith.constant 0 : i32
    %c0_i32_0 = arith.constant 0 : i32
    return %arg1, %c0_i32 : i32, i32
  }
  func.func @transform_2(%arg0: i32, %arg1: i32, %arg2: i32) -> (i32, i32) {
    %c0_i32 = arith.constant 0 : i32
    %c0_i32_0 = arith.constant 0 : i32
    return %arg1, %c0_i32 : i32, i32
  }
  func.func @transform_3(%arg0: i32, %arg1: i32, %arg2: i32) -> (i32, i32, i32) {
    %c0_i32 = arith.constant 0 : i32
    return %arg0, %arg1, %arg2 : i32, i32, i32
  }
}

</mosaic_0001>

<bundles_post_ra>
// kernel: tpu_custom_call.1
= control target key start
LH: loop header
LB: loop body
LE: loop exit
PB: predicated region body
PF: predicated region fallthrough
CT: control target
= control target key end

     0   :  { %8 = vsyncpa [#allocation3], 0  ;;  %s883_s0 = inlined_call_operand.vmem [shape: f32[2,4,16], index: 0, kind: input, shape index: {}]   ;;  %s884_s1 = inlined_call_operand.vmem [shape: f32[4,1], index: 1, kind: input, shape index: {}]   ;;  %s885_s2 = inlined_call_operand.vmem [shape: f32[4,1], index: 2, kind: input, shape index: {}]   ;;  %s886_s3 = inlined_call_operand.hbm [shape: f32[2,4,16], index: 3, kind: output, shape index: {}]  }
   0x1   :  { %10 = vsyncpa [#allocation3 + $0x1], 0  ;;  %s742_s12 = smov 0   ;;  %s744_s13 = smov 0  }
   0x2   :  { %s746_s14 = smov 0   ;;  %s748_s15 = smov 0  }
   0x3   :  { %s750_s16 = smov 0   ;;  %s752_s17 = smov 0  }
   0x4 LB: > { %s547_s18 = sadd.s32 4294967295, %s710_s17   ;;  %s548_s19 = sadd.s32 4294967294, %s710_s17   ;;  %s710_s17 = sphi %s752_s17, %s16_s17   ;;  %s706_s16 = sphi %s750_s16, %s893_s16   ;;  %s702_s15 = sphi %s748_s15, %s892_s15   ;;  %s698_s14 = sphi %s746_s14, %s891_s14   ;;  %s694_s13 = sphi %s744_s13, %s890_s13   ;;  %s690_s12 = sphi %s742_s12, %s889_s12  }
   0x5   : > { %s35_s20 = sadd.s32 1, %s706_s16  ;;  %s128_s21 = sadd.s32 1, %s698_s14 }
   0x6   : > { %p37_p0 = scmp.ge.s32.totalorder %s35_s20, 2  ;;  %p138_p1 = scmp.ne.s32.totalorder %s698_s14, %s694_s13 }
   0x7   : > { %p139_p2 = scmp.eq.s32.totalorder %s547_s18, 1  ;;  %p144_p3 = scmp.ne.s32.totalorder %s694_s13, %s690_s12 }
   0x8   : > { %s895_s20 = smov (%p37_p0, %s35_s20), 0  ;;  %p145_p5 = scmp.eq.s32.totalorder %s548_s19, 1 }
   0x9   : > { %p782_p4 = por %p139_p2, %p138_p1  ;;  %s121_s23 = ssub.s32 %s706_s16, %s895_s20 }
   0xa   : > { %p553_p6 = scmp.ge.s32.totalorder %s710_s17, 1  ;;  %p126_p7 = scmp.eq.s32.totalorder %s121_s23, 0 }
   0xb   : > { %p789_p8 = por %p145_p5, %p144_p3  ;;  %p208_p9 = scmp.lt.s32.totalorder %s710_s17, 3 }
   0xc   : > { %s795_s25 = scalar_select %p126_p7, %s698_s14, %s128_s21  }
   0xd   : > { %p209_p10 = pnand %p553_p6, %p208_p9 }
   0xe   : > { %v294_v0 = vld [vmem:[%s884_s1] sm:$0xff] (!%p209_p10)  ;;  %v712_v1 = vmov (!%p209_p10), 0   ;;  %s251_s30 = sand.u32 (!%p209_p10), 1, %s694_s13   ;;  %p257_p11 = scmp.lt.s32.totalorder (!%p209_p10), %s702_s15, 1  ;;  %v713_v16 = vmov (!%p209_p10), 683565275  }
   0xf   : > { %212 = sbr.rel (%p209_p10) target bundleno = 257 (0x101), region = 32  ;;  %631 = vset.pattern.permute.xlu0 (!%p209_p10), %v712_v1  ;;  %v295_v2 = vld [vmem:[%s885_s2] sm:$0xff] (!%p209_p10)  ;;  %v714_v18 = vmov (!%p209_p10), 2475754826   ;;  %v715_v21 = vmov (!%p209_p10), 2131351028  }
  0x10   : > { %298 = vperm.xlu0 (!%p209_p10), %631, %v294_v0   ;;  %v716_v24 = vmov (!%p209_p10), 2102212464   ;;  %v717_v27 = vmov (!%p209_p10), 920167782   ;;  %v718_v30 = vmov (!%p209_p10), 1326507024  }
  0x11   : > { %s554_s9 = sshll.u32 (!%p209_p10), %s251_s30, 3  ;;  %s838_s11 = scalar_lea.sflag (!%p209_p10), [#allocation3], %s251_s30 }
  0x12   : > { %s253_s10 = scalar_lea.vmem (!%p209_p10), [#allocation2], %s554_s9 }
  0x14   : > { %409 = vperm.xlu0 (!%p209_p10), %631, %v295_v2  }
  0x16   : > { %s258_s4 = scalar_select %p257_p11, %s702_s15, 1 }
  0x18   : > { %s555_s5 = sshll.u32 %s258_s4, 2 }
  0x19   : > { %s266_s8 = scalar_lea.vmem %s883_s0, %s555_s5 }
  0x1a   : > { %v809_v3 = vld [vmem:[%s266_s8] sm:$0xff] }
  0x8f   : > { %v299_v4 = vpop.permute.xlu0 %298 }
  0x90   : > { %v812_v5 = vmul.f32 %v299_v4, %v809_v3 }
  0x92   : > { %v305_v6 = vand.u32 2139095040, %v812_v5  ;;  %v302_v10 = vand.u32 2147483647, %v812_v5  ;;  %vm304_vm7 = vcmp.lt.s32.totalorder %v812_v5, 0  ;;  %vm394_vm12 = vweird.f32 %v812_v5 }
  0x94   : > { %v306_v7 = vshrl.u32 %v305_v6, 23  ;;  %v309_v13 = vand.u32 8388607, %v302_v10  ;;  %vm303_vm8 = vcmp.le.f32.partialorder %v302_v10, 0.7853982 }
  0x96   : > { %v556_v8 = vadd.s32 4294967169, %v306_v7  ;;  %v310_v32 = vor.u32 8388608, %v309_v13 }
  0x98   : > { %v312_v9 = vadd.s32 1, %v556_v8  ;;  %v350_v46 = vshll.u32 %v310_v32, 8 }
  0x9a   : > { %vm313_vm0 = vcmp.gt.s32.totalorder %v312_v9, 0 }
  0x9b   : > { %v314_v11 = vsel %vm313_vm0, %v312_v9, 0 }
  0x9c   : > { %v316_v12 = vand.u32 31, %v314_v11  ;;  %v315_v15 = vshrl.u32 %v314_v11, 5 }
  0x9e   : > { %v317_v14 = vsub.s32 32, %v316_v12  ;;  %v319_v17 = vshll.u32 %v713_v16, %v316_v12  ;;  %v322_v19 = vshll.u32 %v714_v18, %v316_v12  ;;  %v325_v23 = vshll.u32 %v715_v21, %v316_v12 }
  0x9f   : > { %v328_v26 = vshll.u32 %v716_v24, %v316_v12  ;;  %v331_v29 = vshll.u32 %v717_v27, %v316_v12  ;;  %vm334_vm1 = vcmp.lt.s32.totalorder %v315_v15, 1  ;;  %vm337_vm2 = vcmp.lt.s32.totalorder %v315_v15, 4 }
  0xa0   : > { %v320_v20 = vshrl.u32 %v714_v18, %v317_v14  ;;  %v323_v22 = vshrl.u32 %v715_v21, %v317_v14  ;;  %v326_v25 = vshrl.u32 %v716_v24, %v317_v14  ;;  %v329_v28 = vshrl.u32 %v717_v27, %v317_v14 }
  0xa1   : > { %v332_v31 = vshrl.u32 %v718_v30, %v317_v14  ;;  %v318_v41 = vshrl.u32 %v713_v16, %v317_v14  ;;  %vm336_vm3 = vcmp.lt.s32.totalorder %v315_v15, 3  ;;  %vm335_vm4 = vcmp.lt.s32.totalorder %v315_v15, 2 }
  0xa2   : > { %v321_v33 = vor.u32 %v320_v20, %v319_v17  ;;  %v324_v34 = vor.u32 %v323_v22, %v322_v19  ;;  %v327_v35 = vor.u32 %v326_v25, %v325_v23  ;;  %v330_v36 = vor.u32 %v329_v28, %v328_v26 }
  0xa3   : > { %v333_v37 = vor.u32 %v332_v31, %v331_v29 }
  0xa4   : > { %v339_v38 = vsel %vm337_vm2, %v327_v35, 2102212464  ;;  %v342_v39 = vsel %vm334_vm1, %v321_v33, %v324_v34  ;;  %v346_v40 = vsel %vm334_vm1, %v324_v34, %v327_v35  ;;  %v343_v42 = vsel %vm337_vm2, %v330_v36, 920167782 }
  0xa5   : > { %v347_v43 = vsel %vm337_vm2, %v333_v37, 1326507024  ;;  %v344_v44 = vsel %vm336_vm3, %v327_v35, %v343_v42  ;;  %v338_v47 = vsel %vm334_vm1, %v318_v41, %v321_v33  ;;  %v340_v48 = vsel %vm336_vm3, %v324_v34, %v339_v38 }
  0xa6   : > { %v348_v45 = vsel %vm336_vm3, %v330_v36, %v347_v43  ;;  %v345_v49 = vsel %vm335_vm4, %v342_v39, %v344_v44  ;;  %v341_v55 = vsel %vm335_vm4, %v338_v47, %v340_v48  ;;  %v410_v36 = vpop.permute.xlu0 %409 }
  0xa7   : > { %v349_v50 = vsel %vm335_vm4, %v346_v40, %v348_v45  ;;  %v821_v53 = vmul.u32.u64.low %v350_v46, %v345_v49  ;;  %v822_v54 = vmul.u32.u64.high %v350_v46, %v345_v49, %v821_v53  ;;  %v357_v57 = vmul.u32 %v350_v46, %v341_v55 }
  0xa8   : > { %v818_v51 = vmul.u32.u64.low %v350_v46, %v349_v50  ;;  %v819_v52 = vmul.u32.u64.high %v350_v46, %v349_v50, %v818_v51 }
  0xa9   : > { %v360_v56 = vadd.s32 1, %v822_v54 }
  0xaa   : > { %vm359_vm5 = vc.u32 %v819_v52, %v821_v53  ;;  %v358_v7 = vadd.s32 %v821_v53, %v819_v52 }
  0xab   : > { %v361_v58 = vsel %vm359_vm5, %v360_v56, %v822_v54 }
  0xac   : > { %v362_v59 = vadd.s32 %v361_v58, %v357_v57 }
  0xae   : > { %v363_v60 = vadd.s32 536870912, %v362_v59 }
  0xb0   : > { %v364_v61 = vshrl.u32 %v363_v60, 30 }
  0xb2   : > { %v365_v62 = vshll.u32 %v364_v61, 30  ;;  %v388_v20 = vsub.s32 4, %v364_v61 }
  0xb4   : > { %v366_v63 = vsub.s32 %v362_v59, %v365_v62  ;;  %v389_v23 = vsel %vm304_vm7, %v388_v20, %v364_v61 }
  0xb5   : > { %v391_v25 = vsel %vm303_vm8, 0, %v389_v23 }
  0xb6   : > { %v368_v0 = vsub.s32 0, %v366_v63  ;;  %v395_v26 = vadd.s32 3, %v391_v25 }
  0xb8   : > { %v557_v1 = vmin.u32 %v368_v0, %v366_v63  ;;  %v396_v27 = vand.u32 3, %v395_v26 }
  0xba   : > { %v370_v2 = vclz %v557_v1  ;;  %vm401_vm9 = vcmp.eq.s32.totalorder %v396_v27, 2  ;;  %vm398_vm10 = vcmp.eq.s32.totalorder %v396_v27, 0  ;;  %vm397_vm11 = vcmp.lt.s32.totalorder %v396_v27, 2 }
  0xbc   : > { %v558_v4 = vadd.s32 4294967294, %v370_v2 }
  0xbe   : > { %vm559_vm6 = vcmp.lt.s32.totalorder %v558_v4, 0 }
  0xbf   : > { %v373_v6 = vsel %vm559_vm6, 0, %v558_v4 }
  0xc0   : > { %v374_v8 = vsub.s32 32, %v373_v6  ;;  %v378_v9 = vsub.s32 4294967266, %v373_v6  ;;  %v375_v11 = vshll.u32 %v366_v63, %v373_v6 }
  0xc2   : > { %v376_v12 = vshrl.u32 %v358_v7, %v374_v8  ;;  %v379_v13 = vadd.s32 127, %v378_v9 }
  0xc4   : > { %v377_v14 = vor.u32 %v376_v12, %v375_v11  ;;  %v380_v15 = vshll.u32 %v379_v13, 23 }
  0xc6   : > { %v381_v16 = vor.u32 4788187, %v380_v15  ;;  %v384_v18 = vcvt.s32.f32 %v377_v14 }
  0xc8   : > { %v382_v17 = vand.u32 2147483647, %v381_v16 }
  0xca   : > { %v385_v19 = vmul.f32 %v384_v18, %v382_v17 }
  0xcc   : > { %v386_v21 = vxor.u32 2147483648, %v385_v19 }
  0xce   : > { %v387_v22 = vsel %vm304_vm7, %v386_v21, %v385_v19 }
  0xcf   : > { %v390_v24 = vsel %vm303_vm8, %v812_v5, %v387_v22 }
  0xd0   : > { %632 = vcosq.f32 %v390_v24 }
  0xd1   : > { %634 = vsinq.f32 %v390_v24 }
  0xda   : > { %v633_v28 = vpop.eup %632 }
  0xdb   : > { %v635_v29 = vpop.eup %634  ;;  %v402_v30 = vxor.u32 2147483648, %v633_v28 }
  0xdc   : > { %v399_v31 = vxor.u32 2147483648, %v635_v29 }
  0xdd   : > { %v403_v32 = vsel %vm401_vm9, %v402_v30, %v635_v29 }
  0xde   : > { %v400_v33 = vsel %vm398_vm10, %v633_v28, %v399_v31 }
  0xdf   : > { %v404_v10 = vsel %vm397_vm11, %v400_v33, %v403_v32 }
  0xe0   : > { %v405_v34 = vsel %vm394_vm12, nan, %v404_v10 }
  0xe1   : > { %v406_v35 = vmul.f32 %v405_v34, %v405_v34  ;;  %422 = sbr.rel (!%p782_p4) target bundleno = 257 (0x101), region = 36 }
  0xe3   : > { %v412_v37 = vmul.f32 %v410_v36, %v406_v35 }
  0xe5   : > { %v413_v38 = vadd.f32 %v412_v37, %v809_v3 }
  0xe7   : > { %414 = vst [vmem:[%s253_s10] sm:$0xff] %v413_v38 }
  0xe8   : > { %428 = vsyncadd %s838_s11, 64  ;;  %s561_s18 = sshll.u32 %s702_s15, 6  ;;  %s435_s19 = sshll.u32 %s253_s10, 4  ;;  %s436_s19 = int_to_ptr.vmem [resolvable:$true] %s435_s19 }
  0xe9   : > { %s847_s26 = scalar_lea.hbm %s886_s3, %s561_s18  ;;  %s636_s27 = scalar_lea.vmem %s436_s19, 64 }
  0xea   : > { %p637_p12 = scmp.ne.s32.totalorder %s436_s19, %s636_s27  ;;  %s719_s28 = smov [#allocation2]  }
  0xeb   : > { %s638_s29 = sshll.u32 %s719_s28, 4  ;;  %s639_s29 = int_to_ptr.vmem [resolvable:$false] %s638_s29 }
  0xec   : > { %s640_s30 = scalar_lea.vmem %s639_s29, 256  ;;  %p641_p13 = scmp.lt.s32.totalorder %s436_s19, %s639_s29 }
  0xed   : > { %p642_p0 = scmp.lt.s32.totalorder %s640_s30, %s636_s27 }
  0xef   : > { %p643_p1 = por %p642_p0, %p641_p13 }
  0xf1   : > { %p644_p2 = pnand %p643_p1, %p637_p12 }
  0xf3   : > { %647 = shalt.err (!%p644_p2)
}
  0xf4   : > { %s648_s15 = scalar_lea.hbm %s847_s26, 64  ;;  %s650_s5 = scalar_lea.hbm %s886_s3, 128 }
  0xf5   : > { %p649_p3 = scmp.ne.s32.totalorder %s847_s26, %s648_s15  ;;  %p651_p4 = scmp.lt.u32.totalorder %s847_s26, %s886_s3 }
  0xf6   : > { %p652_p5 = scmp.lt.u32.totalorder %s650_s5, %s648_s15  ;;  %p654_p7 = scmp.lt.u32.totalorder %s648_s15, %s847_s26 }
  0xf8   : > { %p653_p6 = por %p652_p5, %p651_p4 }
  0xfa   : > { %p655_p9 = por %p654_p7, %p653_p6 }
  0xfc   : > { %p656_p10 = pnand %p655_p9, %p649_p3 }
  0xfe   : > { %659 = shalt.err (!%p656_p10)
}
  0xff   : > { %s720_s8 = smov 64   ;;  %s721_s9 = smov 4  }
 0x100   : > { %441 = dma.vmem_to_hbm [thread:$0]  %s436_s19, 64, %s847_s26, %s838_s11, %s720_s8, %s720_s8, %s721_s9  }
 0x101 PF: > { %p573_p11 = scmp.ge.s32.totalorder %s710_s17, 2  ;;  %s450_s10 = sand.u32 1, %s690_s12  }
 0x102   : > { %s451_s18 = scalar_lea.sflag [#allocation3], %s450_s10 }
 0x103   : > { %p570_p12 = pnand %p573_p11, %p789_p8 }
 0x105   : > { %685 = dma.done.wait (!%p570_p12), %s451_s18, 128  }
 0x106   : > { %687 = vsyncadd (!%p570_p12), %s451_s18, 4294967168  ;;  %s16_s17 = sadd.s32 1, %s710_s17   ;;  %s889_s12 = smov %s694_s13 }
 0x107   : > { %p13_p13 = scmp.ge.s32.totalorder %s16_s17, 4   ;;  %s890_s13 = smov %s698_s14 }
 0x108   : > { %s891_s14 = smov %s795_s25  ;;  %s892_s15 = smov %s706_s16 }
 0x109   : > { %s893_s16 = smov %s895_s20  ;;  %15 = sbr.rel (!%p13_p13) target bundleno = 4 (0x4), region = 73 }
 0x110   :  { %456 = vsyncpa [#allocation3], 1 }
 0x111   :  { %458 = vsyncpa [#allocation3 + $0x1], 1 }

</bundles_post_ra>
